<compile_context>
chip_gen: v6e
topology: v6e:2x2x1
jax: 0.10.0
libtpu: 0.0.40
codegen_flags: <defaults>
</compile_context>

<pallas_src>
import functools

import jax
import jax.numpy as jnp
from jax.experimental import pallas as pl
from jax.experimental.pallas import tpu as pltpu

_LANES = 128


def _swish_kernel(x_ref, o_ref):
    x = x_ref[...]
    # sigmoid(x) == 0.5 * (1 + tanh(0.5 * x)): a single EUP transcendental per
    # element; the surrounding mul/add ride the VPU slots and stay hidden under
    # the HBM-bound DMA stream on all generations.
    xf = x.astype(jnp.float32)
    sig = 0.5 * (1.0 + jnp.tanh(0.5 * xf))
    o_ref[...] = (xf * sig).astype(o_ref.dtype)


def _round_up(a: int, b: int) -> int:
    return ((a + b - 1) // b) * b


@functools.lru_cache(maxsize=None)
def _vmem_capacity_bytes() -> int:
    try:
        return int(pltpu.get_tpu_info().vmem_capacity_bytes)
    except Exception:
        return 64 << 20  # conservative (v7x-class) fallback


def _pick_tile_rows(rows: int, itemsize: int) -> int:
    """Trace-time choice of rows-per-block for the (rows, 128) slab."""
    sub_mult = max(8, 32 // itemsize)  # sublane packing floor per dtype
    vmem = _vmem_capacity_bytes()
    two_tc = vmem < (96 << 20)  # v7x-class: 64 MiB VMEM per TC, 2 TCs/chip

    # Per-buffer block target: ~8 MiB on v7x (fast HBM -> keep the 0.35 us
    # per-step overhead under ~7%), ~12 MiB on 128 MiB-VMEM v5e/v6e parts.
    target_bytes = (8 << 20) if two_tc else (12 << 20)
    target_rows = max(
        sub_mult, (target_bytes // (_LANES * itemsize)) // sub_mult * sub_mult
    )

    tile = max(sub_mult, min(_round_up(rows, sub_mult), target_rows))

    if two_tc:
        # Keep both TensorCores busy: at least 2 grid steps when possible ...
        if rows >= 2 * sub_mult:
            tile = min(tile, _round_up(-(-rows // 2), sub_mult))
        # ... and prefer an even step count so work splits evenly across TCs.
        steps = -(-rows // tile)
        if steps > 1 and steps % 2 == 1:
            t = tile
            for _ in range(64):  # bounded, trace-time-only search
                t -= sub_mult
                if t < sub_mult:
                    break
                if (-(-rows // t)) % 2 == 0:
                    tile = t
                    break
    return tile


def _swish_2d(x2d: jax.Array, tile_rows: int) -> jax.Array:
    rows, lanes = x2d.shape
    block_bytes = tile_rows * lanes * jnp.dtype(x2d.dtype).itemsize
    # 2 pipeline buffers x (in block + out block) plus slack; always well under
    # v7x's 64 MiB physical VMEM at the block sizes chosen above.
    vmem_limit = min(4 * block_bytes + (8 << 20), 64 << 20)
    return pl.pallas_call(
        _swish_kernel,
        out_shape=jax.ShapeDtypeStruct((rows, lanes), x2d.dtype),
        grid_spec=pltpu.PrefetchScalarGridSpec(
            num_scalar_prefetch=0,
            grid=(pl.cdiv(rows, tile_rows),),
            in_specs=[pl.BlockSpec((tile_rows, lanes), lambda i: (i, 0))],
            out_specs=pl.BlockSpec((tile_rows, lanes), lambda i: (i, 0)),
        ),
        # True in-place update (mirrors torch x.mul_) once the outer jit donates
        # the input buffer; halves HBM traffic vs. a separate output allocation.
        input_output_aliases={0: 0},
        compiler_params=pltpu.CompilerParams(
            dimension_semantics=("parallel",),
            vmem_limit_bytes=vmem_limit,
        ),
    )(x2d)


@functools.partial(jax.jit, donate_argnums=0)
def swish(x: jax.Array) -> jax.Array:
    """Elementwise swish, equivalent to PyTorch Swish.forward (inplace=True).

    In-place contract: the input buffer is donated and reused for the output;
    callers must not read `x` after this call (same as torch's mul_).
    """
    orig_shape = x.shape
    dtype = x.dtype
    n = x.size
    if n == 0:
        return x

    itemsize = jnp.dtype(dtype).itemsize
    x_flat = jnp.ravel(x)

    main_n = (n // _LANES) * _LANES
    if main_n == 0:
        # Tensor smaller than a single 128-lane row: plain jnp is all we need.
        return (x_flat * jax.nn.sigmoid(x_flat)).reshape(orig_shape)

    rows = main_n // _LANES
    tile_rows = _pick_tile_rows(rows, itemsize)

    out_main = _swish_2d(x_flat[:main_n].reshape(rows, _LANES), tile_rows)
    out_flat = out_main.reshape(-1)

    if main_n != n:
        # Rare ragged tail (< 128 elements, never hit by conv activations):
        # handled with plain jnp instead of padding + slicing the full tensor.
        tail = x_flat[main_n:]
        out_flat = jnp.concatenate([out_flat, tail * jax.nn.sigmoid(tail)])

    return out_flat.reshape(orig_shape)


if __name__ == "__main__":
    key = jax.random.PRNGKey(0)
    # Shapes consistent with an NCHW conv-net activation: batch=2, channels=4,
    # spatial 16x16.
    x = jax.random.normal(key, (2, 4, 16, 16), dtype=jnp.float32)
    shape, dtype = x.shape, x.dtype

    # Reference must be computed BEFORE calling swish(): the input buffer is
    # donated (in-place semantics) and is invalid afterwards.
    y_ref = x * jax.nn.sigmoid(x)

    y = jax.block_until_ready(swish(x))

    assert y.shape == shape and y.dtype == dtype
    assert jnp.allclose(y, y_ref, atol=1e-5, rtol=1e-5)

    print("KERNEL_OK")
</pallas_src>

<mosaic_0001>
module attributes {stable_mosaic.version = 11 : i64} {
  func.func @_swish_kernel(%arg0: i32, %arg1: memref<8x128xf32, #tpu.memory_space<vmem>>, %arg2: memref<8x128xf32, #tpu.memory_space<vmem>>) attributes {dimension_semantics = [#tpu.dimension_semantics<parallel>], iteration_bounds = array<i64: 2>, scalar_prefetch = 0 : i64, scratch_operands = 0 : i64, tpu.core_type = #tpu.core_type<tc>, window_params = [{transform_indices = @transform_0, window_bounds = array<i64: 8, 128>}, {transform_indices = @transform_1, window_bounds = array<i64: 8, 128>}]} {
    %c0 = arith.constant 0 : index
    %c0_0 = arith.constant 0 : index
    %0 = vector.load %arg1[%c0, %c0_0] : memref<8x128xf32, #tpu.memory_space<vmem>>, vector<8x128xf32>
    %cst = arith.constant 5.000000e-01 : f32
    %1 = vector.broadcast %cst : f32 to vector<8x128xf32>
    %2 = arith.mulf %1, %0 : vector<8x128xf32>
    %3 = math.tanh %2 : vector<8x128xf32>
    %cst_1 = arith.constant 1.000000e+00 : f32
    %4 = vector.broadcast %cst_1 : f32 to vector<8x128xf32>
    %5 = arith.addf %4, %3 : vector<8x128xf32>
    %cst_2 = arith.constant 5.000000e-01 : f32
    %6 = vector.broadcast %cst_2 : f32 to vector<8x128xf32>
    %7 = arith.mulf %6, %5 : vector<8x128xf32>
    %8 = arith.mulf %0, %7 : vector<8x128xf32>
    %c0_3 = arith.constant 0 : index
    %c0_4 = arith.constant 0 : index
    %9 = vector.load %arg2[%c0_3, %c0_4] : memref<8x128xf32, #tpu.memory_space<vmem>>, vector<8x128xf32>
    tpu.vector_store %arg2[%c0_3, %c0_4], %8 {strides = array<i32>} : memref<8x128xf32, #tpu.memory_space<vmem>>, vector<8x128xf32>,
    return
  }
  func.func @transform_0(%arg0: i32) -> (i32, i32) {
    %c0_i32 = arith.constant 0 : i32
    %c0_i32_0 = arith.constant 0 : i32
    return %arg0, %c0_i32 : i32, i32
  }
  func.func @transform_1(%arg0: i32) -> (i32, i32) {
    %c0_i32 = arith.constant 0 : i32
    %c0_i32_0 = arith.constant 0 : i32
    return %arg0, %c0_i32 : i32, i32
  }
}

</mosaic_0001>

<bundles_post_ra>
// kernel: swish.1
= control target key start
LH: loop header
LB: loop body
LE: loop exit
PB: predicated region body
PF: predicated region fallthrough
CT: control target
= control target key end

     0   :  { %s195_s6 = smov 0   ;;  %s215_s0 = inlined_call_operand.vmem [shape: f32[16,128], index: 0, kind: input, shape index: {}, may-alias: {0,1}]   ;;  %s216_s1 = inlined_call_operand.vmem [shape: f32[16,128], index: 1, kind: output, shape index: {}, may-alias: {0,1}]  }
   0x1 LB: > { %s172_s7 = sadd.s32 4294967295, %s197_s6   ;;  %p176_p0 = scmp.ge.s32.totalorder %s197_s6, 1  ;;  %s197_s6 = sphi %s195_s6, %s11_s6  }
   0x2   : > { %p86_p1 = scmp.lt.s32.totalorder %s197_s6, 3 }
   0x4   : > { %p87_p2 = pnand %p176_p0, %p86_p1 }
   0x5   : > { %p104_p3 = scmp.lt.s32.totalorder (!%p87_p2), %s172_s7, 1 }
   0x6   : > { %90 = sbr.rel (%p87_p2) target bundleno = 38 (0x26), region = 24 }
   0xb   : > { %s218_s7 = smov (!%p104_p3, %s172_s7), 1 }
   0xc   : > { %s177_s8 = sshll.u32 %s218_s7, 3 }
   0xd   : > { %s107_s11 = scalar_lea.vmem %s215_s0, %s177_s8  ;;  %s111_s14 = scalar_lea.vmem %s216_s1, %s177_s8 }
   0xe   : > { %v112_v0 = vld [vmem:[%s107_s11] sm:$0xff] }
   0xf   : > { %v113_v1 = vmul.f32 0.5, %v112_v0 }
  0x11   : > { %189 = vtanh.f32 %v113_v1 }
  0x1e   : > { %v190_v2 = vpop.eup %189 }
  0x1f   : > { %v115_v3 = vadd.f32 1.0, %v190_v2 }
  0x21   : > { %v116_v4 = vmul.f32 0.5, %v115_v3 }
  0x23   : > { %v117_v5 = vmul.f32 %v116_v4, %v112_v0 }
  0x25   : > { %118 = vst [vmem:[%s111_s14] sm:$0xff] %v117_v5 }
  0x26 PF: > { %s11_s6 = sadd.s32 1, %s197_s6  }
  0x27   : > { %p8_p4 = scmp.ge.s32.totalorder %s11_s6, 4  }
  0x29   :  { %10 = sbr.rel (!%p8_p4) target bundleno = 1 (0x1), region = 54 }

</bundles_post_ra>
